<compile_context>
chip_gen: v7x
topology: tpu7x:2x2x1
jax: 0.10.0
libtpu: 0.0.40
codegen_flags: <defaults>
</compile_context>

<pallas_src>
import jax
import jax.numpy as jnp
from jax.experimental import pallas as pl
from jax.experimental.pallas import tpu as pltpu


def _round_up(x, m):
    return ((x + m - 1) // m) * m


def _make_qfunc_kernel(n_inputs):
    """Build the fused 3-layer MLP kernel for `n_inputs` concatenated inputs."""

    def kernel(*refs):
        xs = refs[:n_inputs]                       # obs components + act
        w1s = refs[n_inputs:2 * n_inputs]          # row-slices of W1 (bf16)
        b1_ref, w2_ref, b2_ref, w3_ref, b3_ref, o_ref = refs[2 * n_inputs:]

        # ---- Layer 1: concat fused as a sum of partial matmuls -------------
        # h1 = cat(xs) @ W1 + b1 == sum_i xs[i] @ W1[rows_i] + b1
        h1 = jnp.dot(xs[0][...].astype(jnp.bfloat16), w1s[0][...],
                     preferred_element_type=jnp.float32)
        for i in range(1, n_inputs):
            h1 = h1 + jnp.dot(xs[i][...].astype(jnp.bfloat16), w1s[i][...],
                              preferred_element_type=jnp.float32)
        h1 = jnp.maximum(h1 + b1_ref[...], 0.0)          # f32 bias + ReLU

        # ---- Layer 2 --------------------------------------------------------
        h2 = jnp.dot(h1.astype(jnp.bfloat16), w2_ref[...],
                     preferred_element_type=jnp.float32)
        h2 = jnp.maximum(h2 + b2_ref[...], 0.0)

        # ---- Layer 3 (H2 -> 1): VPU multiply + lane reduce ------------------
        # Avoids the N=1 MXU matmul and the lane-padded (256,1) weight tile.
        q = jnp.sum(h2 * w3_ref[...], axis=-1, keepdims=True) + b3_ref[0]
        o_ref[...] = q.astype(o_ref.dtype)               # (tb, 1)

    return kernel


def prepare_params(params, input_dims):
    """One-time param prep: split W1 per input component, cast weights to bf16.

    `params` = (w1, b1, w2, b2, w3, b3) with w* as (in, out), b* as (1, out).
    """
    w1, b1, w2, b2, w3, b3 = params
    w1_parts = []
    off = 0
    for d in input_dims:
        w1_parts.append(w1[off:off + d, :].astype(jnp.bfloat16))
        off += d
    assert off == w1.shape[0], "input_dims must sum to W1's fan-in"
    return (
        tuple(w1_parts),                         # bf16 row-slices of W1
        b1.astype(jnp.float32),                  # (1, H1) f32
        w2.astype(jnp.bfloat16),                 # (H1, H2) bf16
        b2.astype(jnp.float32),                  # (1, H2) f32
        w3.reshape(1, -1).astype(jnp.float32),   # (1, H2) row for VPU reduce
        b3.reshape(-1).astype(jnp.float32),      # (1,) scalar -> SMEM
    )


def mlp_q_function(obs, act, kparams, *, block_b=256):
    """obs: tuple of (B, d_i) arrays, act: (B, act_dim). Returns (B,) Q-values."""
    inputs = tuple(obs) + (act,)
    w1s, b1, w2, b2, w3_row, b3 = kparams
    assert len(w1s) == len(inputs)
    n_in = len(inputs)
    B = inputs[0].shape[0]
    H1 = b1.shape[1]
    H2 = b2.shape[1]

    # Batch tiling: tb rows per grid step (multiple of 8 sublanes); pad batch.
    tb = min(block_b, _round_up(B, 8))
    b_pad = _round_up(B, tb)
    g = b_pad // tb
    if b_pad != B:
        inputs = tuple(jnp.pad(x, ((0, b_pad - B), (0, 0))) for x in inputs)

    # Activations tile over the batch grid; weights are full resident blocks
    # (constant index_map -> DMA'd once, reused across all batch tiles).
    x_specs = [pl.BlockSpec((tb, x.shape[1]), lambda i: (i, 0)) for x in inputs]
    w1_specs = [pl.BlockSpec(w.shape, lambda i: (0, 0)) for w in w1s]

    out = pl.pallas_call(
        _make_qfunc_kernel(n_in),
        out_shape=jax.ShapeDtypeStruct((b_pad, 1), jnp.float32),
        grid=(g,),
        in_specs=x_specs + w1_specs + [
            pl.BlockSpec((1, H1), lambda i: (0, 0)),             # b1
            pl.BlockSpec((H1, H2), lambda i: (0, 0)),            # w2
            pl.BlockSpec((1, H2), lambda i: (0, 0)),             # b2
            pl.BlockSpec((1, H2), lambda i: (0, 0)),             # w3 row
            pl.BlockSpec(memory_space=pltpu.MemorySpace.SMEM),   # b3 scalar
        ],
        out_specs=pl.BlockSpec((tb, 1), lambda i: (i, 0)),
        compiler_params=pltpu.CompilerParams(
            dimension_semantics=("parallel",)),  # batch tiles -> both TCs on v7x
    )(*inputs, *w1s, b1, w2, b2, w3_row, b3)

    # TODO(synk): at training-scale B, emit a lane-dense (g, tb) output slab
    # instead of (b_pad, 1) to avoid masked stores; negligible at small B.
    return out[:B, 0]


def init_params(key, obs_dim, act_dim, hidden_sizes=(256, 256)):
    """PyTorch-Linear-style init (U[-1/sqrt(fan_in), 1/sqrt(fan_in)]), f32."""
    sizes = [obs_dim + act_dim] + list(hidden_sizes) + [1]
    params = []
    for j in range(len(sizes) - 1):
        fan_in, fan_out = sizes[j], sizes[j + 1]
        key, kw, kb = jax.random.split(key, 3)
        bound = 1.0 / jnp.sqrt(fan_in)
        w = jax.random.uniform(kw, (fan_in, fan_out), jnp.float32, -bound, bound)
        b = jax.random.uniform(kb, (1, fan_out), jnp.float32, -bound, bound)
        params += [w, b]
    return tuple(params)


def reference(obs, act, params):
    x = jnp.concatenate((*obs, act), axis=-1)
    w1, b1, w2, b2, w3, b3 = params
    h1 = jnp.maximum(x @ w1 + b1, 0.0)
    h2 = jnp.maximum(h1 @ w2 + b2, 0.0)
    return jnp.squeeze(h2 @ w3 + b3, -1)


if __name__ == "__main__":
    key = jax.random.PRNGKey(0)

    # Small synthetic spec: obs_space = two Box spaces with shapes (12,), (6,);
    # act_space.shape = (6,)  ->  obs_dim = 18, act_dim = 6, d_in = 24.
    B = 8
    obs_dims = [12, 6]
    act_dim = 6
    obs_dim = sum(obs_dims)

    key, k_params, k_o1, k_o2, k_a = jax.random.split(key, 5)
    params = init_params(k_params, obs_dim, act_dim, hidden_sizes=(256, 256))
    kparams = prepare_params(params, obs_dims + [act_dim])   # one-time prep

    obs = (
        jax.random.normal(k_o1, (B, obs_dims[0]), jnp.float32),
        jax.random.normal(k_o2, (B, obs_dims[1]), jnp.float32),
    )
    act = jax.random.normal(k_a, (B, act_dim), jnp.float32)

    q = mlp_q_function(obs, act, kparams)
    q = jax.block_until_ready(q)

    q_ref = reference(obs, act, params)
    assert q.shape == (B,)
    # bf16 weights -> loosened tolerance vs. the f32 reference.
    assert jnp.allclose(q, q_ref, atol=3e-2, rtol=3e-2), (q, q_ref)
    print("KERNEL_OK")
</pallas_src>

<mosaic_0001>
module attributes {stable_mosaic.version = 11 : i64} {
  func.func @kernel(%arg0: i32, %arg1: memref<8x12xf32, #tpu.memory_space<vmem>>, %arg2: memref<8x6xf32, #tpu.memory_space<vmem>>, %arg3: memref<8x6xf32, #tpu.memory_space<vmem>>, %arg4: memref<12x256xbf16, #tpu.memory_space<vmem>>, %arg5: memref<6x256xbf16, #tpu.memory_space<vmem>>, %arg6: memref<6x256xbf16, #tpu.memory_space<vmem>>, %arg7: memref<1x256xf32, #tpu.memory_space<vmem>>, %arg8: memref<256x256xbf16, #tpu.memory_space<vmem>>, %arg9: memref<1x256xf32, #tpu.memory_space<vmem>>, %arg10: memref<1x256xf32, #tpu.memory_space<vmem>>, %arg11: memref<1xf32, #tpu.memory_space<smem>>, %arg12: memref<8x1xf32, #tpu.memory_space<vmem>>) attributes {dimension_semantics = [#tpu.dimension_semantics<parallel>], iteration_bounds = array<i64: 1>, scalar_prefetch = 0 : i64, scratch_operands = 0 : i64, tpu.core_type = #tpu.core_type<tc>, window_params = [{transform_indices = @transform_0, window_bounds = array<i64: 8, 12>}, {transform_indices = @transform_1, window_bounds = array<i64: 8, 6>}, {transform_indices = @transform_2, window_bounds = array<i64: 8, 6>}, {pipeline_mode = #tpu.pipeline_mode<synchronous>, transform_indices = @transform_3, window_bounds = array<i64: 12, 256>}, {pipeline_mode = #tpu.pipeline_mode<synchronous>, transform_indices = @transform_4, window_bounds = array<i64: 6, 256>}, {pipeline_mode = #tpu.pipeline_mode<synchronous>, transform_indices = @transform_5, window_bounds = array<i64: 6, 256>}, {pipeline_mode = #tpu.pipeline_mode<synchronous>, transform_indices = @transform_6, window_bounds = array<i64: 1, 256>}, {pipeline_mode = #tpu.pipeline_mode<synchronous>, transform_indices = @transform_7, window_bounds = array<i64: 256, 256>}, {pipeline_mode = #tpu.pipeline_mode<synchronous>, transform_indices = @transform_8, window_bounds = array<i64: 1, 256>}, {pipeline_mode = #tpu.pipeline_mode<synchronous>, transform_indices = @transform_9, window_bounds = array<i64: 1, 256>}, {transform_indices = @transform_10, window_bounds = array<i64: 1>}, {transform_indices = @transform_11, window_bounds = array<i64: 8, 1>}]} {
    %c0 = arith.constant 0 : index
    %c0_0 = arith.constant 0 : index
    %0 = vector.load %arg1[%c0, %c0_0] : memref<8x12xf32, #tpu.memory_space<vmem>>, vector<8x12xf32>
    %1 = arith.truncf %0 : vector<8x12xf32> to vector<8x12xbf16>
    %c0_1 = arith.constant 0 : index
    %c0_2 = arith.constant 0 : index
    %2 = vector.load %arg4[%c0_1, %c0_2] : memref<12x256xbf16, #tpu.memory_space<vmem>>, vector<12x256xbf16>
    %cst = arith.constant dense<0.000000e+00> : vector<8x256xf32>
    %3 = tpu.matmul %1, %2, %cst {dimension_numbers = #tpu.dot_dimension_numbers<[1], [0], [0], [1], [0, 0, 1, 1], [], []>} : vector<8x12xbf16>, vector<12x256xbf16>, vector<8x256xf32> -> vector<8x256xf32>
    %c0_3 = arith.constant 0 : index
    %c0_4 = arith.constant 0 : index
    %4 = vector.load %arg2[%c0_3, %c0_4] : memref<8x6xf32, #tpu.memory_space<vmem>>, vector<8x6xf32>
    %5 = arith.truncf %4 : vector<8x6xf32> to vector<8x6xbf16>
    %c0_5 = arith.constant 0 : index
    %c0_6 = arith.constant 0 : index
    %6 = vector.load %arg5[%c0_5, %c0_6] : memref<6x256xbf16, #tpu.memory_space<vmem>>, vector<6x256xbf16>
    %cst_7 = arith.constant dense<0.000000e+00> : vector<8x256xf32>
    %7 = tpu.matmul %5, %6, %cst_7 {dimension_numbers = #tpu.dot_dimension_numbers<[1], [0], [0], [1], [0, 0, 1, 1], [], []>} : vector<8x6xbf16>, vector<6x256xbf16>, vector<8x256xf32> -> vector<8x256xf32>
    %8 = arith.addf %3, %7 : vector<8x256xf32>
    %c0_8 = arith.constant 0 : index
    %c0_9 = arith.constant 0 : index
    %9 = vector.load %arg3[%c0_8, %c0_9] : memref<8x6xf32, #tpu.memory_space<vmem>>, vector<8x6xf32>
    %10 = arith.truncf %9 : vector<8x6xf32> to vector<8x6xbf16>
    %c0_10 = arith.constant 0 : index
    %c0_11 = arith.constant 0 : index
    %11 = vector.load %arg6[%c0_10, %c0_11] : memref<6x256xbf16, #tpu.memory_space<vmem>>, vector<6x256xbf16>
    %cst_12 = arith.constant dense<0.000000e+00> : vector<8x256xf32>
    %12 = tpu.matmul %10, %11, %cst_12 {dimension_numbers = #tpu.dot_dimension_numbers<[1], [0], [0], [1], [0, 0, 1, 1], [], []>} : vector<8x6xbf16>, vector<6x256xbf16>, vector<8x256xf32> -> vector<8x256xf32>
    %13 = arith.addf %8, %12 : vector<8x256xf32>
    %c0_13 = arith.constant 0 : index
    %c0_14 = arith.constant 0 : index
    %14 = vector.load %arg7[%c0_13, %c0_14] : memref<1x256xf32, #tpu.memory_space<vmem>>, vector<1x256xf32>
    %15 = vector.broadcast %14 : vector<1x256xf32> to vector<8x256xf32>
    %16 = arith.addf %13, %15 : vector<8x256xf32>
    %cst_15 = arith.constant 0.000000e+00 : f32
    %17 = vector.broadcast %cst_15 : f32 to vector<8x256xf32>
    %18 = arith.maximumf %16, %17 : vector<8x256xf32>
    %19 = arith.truncf %18 : vector<8x256xf32> to vector<8x256xbf16>
    %c0_16 = arith.constant 0 : index
    %c0_17 = arith.constant 0 : index
    %20 = vector.load %arg8[%c0_16, %c0_17] : memref<256x256xbf16, #tpu.memory_space<vmem>>, vector<256x256xbf16>
    %cst_18 = arith.constant dense<0.000000e+00> : vector<8x256xf32>
    %21 = tpu.matmul %19, %20, %cst_18 {dimension_numbers = #tpu.dot_dimension_numbers<[1], [0], [0], [1], [0, 0, 1, 1], [], []>} : vector<8x256xbf16>, vector<256x256xbf16>, vector<8x256xf32> -> vector<8x256xf32>
    %c0_19 = arith.constant 0 : index
    %c0_20 = arith.constant 0 : index
    %22 = vector.load %arg9[%c0_19, %c0_20] : memref<1x256xf32, #tpu.memory_space<vmem>>, vector<1x256xf32>
    %23 = vector.broadcast %22 : vector<1x256xf32> to vector<8x256xf32>
    %24 = arith.addf %21, %23 : vector<8x256xf32>
    %cst_21 = arith.constant 0.000000e+00 : f32
    %25 = vector.broadcast %cst_21 : f32 to vector<8x256xf32>
    %26 = arith.maximumf %24, %25 : vector<8x256xf32>
    %c0_22 = arith.constant 0 : index
    %c0_23 = arith.constant 0 : index
    %27 = vector.load %arg10[%c0_22, %c0_23] : memref<1x256xf32, #tpu.memory_space<vmem>>, vector<1x256xf32>
    %28 = vector.broadcast %27 : vector<1x256xf32> to vector<8x256xf32>
    %29 = arith.mulf %26, %28 : vector<8x256xf32>
    %cst_24 = arith.constant dense<0.000000e+00> : vector<8xf32>
    %30 = vector.multi_reduction <add>, %29, %cst_24 [1] : vector<8x256xf32> to vector<8xf32>
    %31 = vector.shape_cast %30 : vector<8xf32> to vector<8x1xf32>
    %c0_25 = arith.constant 0 : index
    %32 = memref.load %arg11[%c0_25] : memref<1xf32, #tpu.memory_space<smem>>
    %33 = vector.broadcast %32 : f32 to vector<8x1xf32>
    %34 = arith.addf %31, %33 : vector<8x1xf32>
    %c0_26 = arith.constant 0 : index
    %c0_27 = arith.constant 0 : index
    %35 = vector.load %arg12[%c0_26, %c0_27] : memref<8x1xf32, #tpu.memory_space<vmem>>, vector<8x1xf32>
    tpu.vector_store %arg12[%c0_26, %c0_27], %34 {strides = array<i32>} : memref<8x1xf32, #tpu.memory_space<vmem>>, vector<8x1xf32>,
    return
  }
  func.func @transform_0(%arg0: i32) -> (i32, i32) {
    %c0_i32 = arith.constant 0 : i32
    %c0_i32_0 = arith.constant 0 : i32
    return %arg0, %c0_i32 : i32, i32
  }
  func.func @transform_1(%arg0: i32) -> (i32, i32) {
    %c0_i32 = arith.constant 0 : i32
    %c0_i32_0 = arith.constant 0 : i32
    return %arg0, %c0_i32 : i32, i32
  }
  func.func @transform_2(%arg0: i32) -> (i32, i32) {
    %c0_i32 = arith.constant 0 : i32
    %c0_i32_0 = arith.constant 0 : i32
    return %arg0, %c0_i32 : i32, i32
  }
  func.func @transform_3(%arg0: i32) -> (i32, i32) {
    %c0_i32 = arith.constant 0 : i32
    %c0_i32_0 = arith.constant 0 : i32
    %c0_i32_1 = arith.constant 0 : i32
    return %c0_i32, %c0_i32_0 : i32, i32
  }
  func.func @transform_4(%arg0: i32) -> (i32, i32) {
    %c0_i32 = arith.constant 0 : i32
    %c0_i32_0 = arith.constant 0 : i32
    %c0_i32_1 = arith.constant 0 : i32
    return %c0_i32, %c0_i32_0 : i32, i32
  }
  func.func @transform_5(%arg0: i32) -> (i32, i32) {
    %c0_i32 = arith.constant 0 : i32
    %c0_i32_0 = arith.constant 0 : i32
    %c0_i32_1 = arith.constant 0 : i32
    return %c0_i32, %c0_i32_0 : i32, i32
  }
  func.func @transform_6(%arg0: i32) -> (i32, i32) {
    %c0_i32 = arith.constant 0 : i32
    %c0_i32_0 = arith.constant 0 : i32
    %c0_i32_1 = arith.constant 0 : i32
    return %c0_i32, %c0_i32_0 : i32, i32
  }
  func.func @transform_7(%arg0: i32) -> (i32, i32) {
    %c0_i32 = arith.constant 0 : i32
    %c0_i32_0 = arith.constant 0 : i32
    %c0_i32_1 = arith.constant 0 : i32
    return %c0_i32, %c0_i32_0 : i32, i32
  }
  func.func @transform_8(%arg0: i32) -> (i32, i32) {
    %c0_i32 = arith.constant 0 : i32
    %c0_i32_0 = arith.constant 0 : i32
    %c0_i32_1 = arith.constant 0 : i32
    return %c0_i32, %c0_i32_0 : i32, i32
  }
  func.func @transform_9(%arg0: i32) -> (i32, i32) {
    %c0_i32 = arith.constant 0 : i32
    %c0_i32_0 = arith.constant 0 : i32
    %c0_i32_1 = arith.constant 0 : i32
    return %c0_i32, %c0_i32_0 : i32, i32
  }
  func.func @transform_10(%arg0: i32) -> i32 {
    %c0_i32 = arith.constant 0 : i32
    %c0_i32_0 = arith.constant 0 : i32
    return %c0_i32 : i32
  }
  func.func @transform_11(%arg0: i32) -> (i32, i32) {
    %c0_i32 = arith.constant 0 : i32
    %c0_i32_0 = arith.constant 0 : i32
    return %arg0, %c0_i32 : i32, i32
  }
}

</mosaic_0001>

<bundles_post_ra>
// kernel: tpu_custom_call.1
= control target key start
LH: loop header
LB: loop body
LE: loop exit
PB: predicated region body
PF: predicated region fallthrough
CT: control target
= control target key end

     0   :  { %17 = vsyncpa [#allocation4], 0  ;;  %s965_s0 = inlined_call_operand.hbm [shape: f32[8,12], index: 0, kind: input, shape index: {}]   ;;  %s966_s1 = inlined_call_operand.hbm [shape: f32[8,6], index: 1, kind: input, shape index: {}]   ;;  %s967_s2 = inlined_call_operand.vmem [shape: f32[8,6], index: 2, kind: input, shape index: {}]   ;;  %s968_s3 = inlined_call_operand.hbm [shape: bf16[12,256], index: 3, kind: input, shape index: {}]   ;;  %s969_s4 = inlined_call_operand.vmem [shape: bf16[6,256], index: 4, kind: input, shape index: {}]   ;;  %s970_s5 = inlined_call_operand.hbm [shape: bf16[6,256], index: 5, kind: input, shape index: {}]   ;;  %s971_s6 = inlined_call_operand.vmem [shape: f32[1,256], index: 6, kind: input, shape index: {}]   ;;  %s972_s7 = inlined_call_operand.hbm [shape: bf16[256,256], index: 7, kind: input, shape index: {}]   ;;  %s973_s8 = inlined_call_operand.vmem [shape: f32[1,256], index: 8, kind: input, shape index: {}]   ;;  %s974_s9 = inlined_call_operand.vmem [shape: f32[1,256], index: 9, kind: input, shape index: {}]   ;;  %s975_s10 = inlined_call_operand.<no memory space> [shape: f32[1], index: 10, kind: input, shape index: {}]   ;;  %s976_s11 = inlined_call_operand.vmem [shape: f32[8,1], index: 11, kind: output, shape index: {}]  }
   0x1   :  { %18 = vsyncpa [#allocation6], 0 }
   0x2   :  { %19 = vsyncpa [#allocation9], 0  ;;  %s803_s17 = smov [#allocation5]   ;;  %s804_s19 = smov [#allocation8]  }
   0x3   :  { %s36_s18 = sshll.u32 %s803_s17, 4  ;;  %s62_s20 = sshll.u32 %s804_s19, 4  ;;  %s37_s18 = int_to_ptr.vmem [resolvable:$true] %s36_s18  ;;  %s63_s20 = int_to_ptr.vmem [resolvable:$true] %s62_s20 }
   0x4   :  { %s687_s23 = scalar_lea.hbm %s966_s1, 128 }
   0x5   :  { %p688_p0 = scmp.ne.s32.totalorder %s966_s1, %s687_s23  ;;  %p691_p1 = scmp.lt.u32.totalorder %s687_s23, %s966_s1 }
   0x7   :  { %p693_p2 = pnand %p691_p1, %p688_p0 }
   0x9   :  { %696 = shalt.err (!%p693_p2)
}
   0xa   :  { %s697_s28 = scalar_lea.vmem %s37_s18, 128  ;;  %p702_p4 = scmp.lt.s32.totalorder %s37_s18, %s37_s18 }
   0xb   :  { %p698_p3 = scmp.ne.s32.totalorder %s37_s18, %s697_s28  ;;  %p703_p5 = scmp.lt.s32.totalorder %s697_s28, %s697_s28 }
   0xd   :  { %p704_p6 = por %p703_p5, %p702_p4 }
   0xf   :  { %p705_p7 = pnand %p704_p6, %p698_p3 }
  0x11   :  { %708 = shalt.err (!%p705_p7)
}
  0x12   :  { %39 = dma.hbm_to_vmem [thread:$0]  %s966_s1, 128, %s37_s18, [#allocation6]  }
  0x13   :  { %s709_s14 = scalar_lea.hbm %s970_s5, 128 }
  0x14   :  { %p710_p8 = scmp.ne.s32.totalorder %s970_s5, %s709_s14  ;;  %p713_p9 = scmp.lt.u32.totalorder %s709_s14, %s970_s5 }
  0x16   :  { %p715_p10 = pnand %p713_p9, %p710_p8 }
  0x18   :  { %718 = shalt.err (!%p715_p10)
}
  0x19   :  { %s719_s21 = scalar_lea.vmem %s63_s20, 128  ;;  %p724_p12 = scmp.lt.s32.totalorder %s63_s20, %s63_s20 }
  0x1a   :  { %p720_p11 = scmp.ne.s32.totalorder %s63_s20, %s719_s21  ;;  %p725_p13 = scmp.lt.s32.totalorder %s719_s21, %s719_s21 }
  0x1c   :  { %p726_p0 = por %p725_p13, %p724_p12 }
  0x1e   :  { %p727_p1 = pnand %p726_p0, %p720_p11 }
  0x20   :  { %730 = shalt.err (!%p727_p1)
}
  0x21   :  { %65 = dma.hbm_to_vmem [thread:$0]  %s970_s5, 128, %s63_s20, [#allocation9]  }
  0x22   :  { %s805_s22 = smov [#allocation3]   ;;  %s806_s24 = smov [#allocation7]  }
  0x23   :  { %s26_s23 = sshll.u32 %s805_s22, 4  ;;  %s47_s25 = sshll.u32 %s806_s24, 4  ;;  %s27_s23 = int_to_ptr.vmem [resolvable:$true] %s26_s23  ;;  %s895_s25 = int_to_ptr.vmem [resolvable:$true] %s47_s25 }
  0x24   :  { %s731_s28 = scalar_lea.hbm %s965_s0, 128 }
  0x25   :  { %p732_p2 = scmp.ne.s32.totalorder %s965_s0, %s731_s28  ;;  %p735_p3 = scmp.lt.u32.totalorder %s731_s28, %s965_s0 }
  0x27   :  { %p737_p4 = pnand %p735_p3, %p732_p2 }
  0x29   :  { %740 = shalt.err (!%p737_p4)
}
  0x2a   :  { %s741_s5 = scalar_lea.vmem %s27_s23, 128  ;;  %p746_p6 = scmp.lt.s32.totalorder %s27_s23, %s27_s23 }
  0x2b   :  { %p742_p5 = scmp.ne.s32.totalorder %s27_s23, %s741_s5  ;;  %p747_p7 = scmp.lt.s32.totalorder %s741_s5, %s741_s5 }
  0x2d   :  { %p748_p8 = por %p747_p7, %p746_p6 }
  0x2f   :  { %p749_p9 = pnand %p748_p8, %p742_p5 }
  0x31   :  { %752 = shalt.err (!%p749_p9)
}
  0x32   :  { %29 = dma.hbm_to_vmem [thread:$0]  %s965_s0, 128, %s27_s23, [#allocation4]  }
  0x33   :  { %s753_s17 = scalar_lea.hbm %s968_s3, 256 }
  0x34   :  { %p754_p10 = scmp.ne.s32.totalorder %s968_s3, %s753_s17  ;;  %p757_p11 = scmp.lt.u32.totalorder %s753_s17, %s968_s3 }
  0x36   :  { %p759_p12 = pnand %p757_p11, %p754_p10 }
  0x38   :  { %762 = shalt.err (!%p759_p12)
}
  0x39   :  { %s763_s22 = scalar_lea.vmem %s895_s25, 256  ;;  %p768_p0 = scmp.lt.s32.totalorder %s895_s25, %s895_s25 }
  0x3a   :  { %p764_p13 = scmp.ne.s32.totalorder %s895_s25, %s763_s22  ;;  %p769_p1 = scmp.lt.s32.totalorder %s763_s22, %s763_s22 }
  0x3c   :  { %p770_p2 = por %p769_p1, %p768_p0 }
  0x3e   :  { %p771_p3 = pnand %p770_p2, %p764_p13 }
  0x40   :  { %774 = shalt.err (!%p771_p3)
}
  0x41   :  { %s807_s0 = smov 128   ;;  %s808_s23 = smov 8  }
  0x42   :  { %53 = dma.hbm_to_vmem [thread:$0]  %s968_s3, 256, %s895_s25, [#allocation6], %s807_s0, %s807_s0, %s808_s23  }
  0x43   :  { %s809_s27 = smov [#allocation10]   ;;  %s775_s12 = scalar_lea.hbm %s972_s7, 4096 }
  0x44   :  { %s73_s28 = sshll.u32 %s809_s27, 4  ;;  %p776_p4 = scmp.ne.s32.totalorder %s972_s7, %s775_s12  ;;  %s74_s28 = int_to_ptr.vmem [resolvable:$true] %s73_s28 }
  0x45   :  { %p779_p5 = scmp.lt.u32.totalorder %s775_s12, %s972_s7 }
  0x47   :  { %p781_p6 = pnand %p779_p5, %p776_p4 }
  0x49   :  { %784 = shalt.err (!%p781_p6)
}
  0x4a   :  { %s785_s15 = scalar_lea.vmem %s74_s28, 4096  ;;  %p790_p8 = scmp.lt.s32.totalorder %s74_s28, %s74_s28 }
  0x4b   :  { %p786_p7 = scmp.ne.s32.totalorder %s74_s28, %s785_s15  ;;  %p791_p9 = scmp.lt.s32.totalorder %s785_s15, %s785_s15 }
  0x4d   :  { %p792_p10 = por %p791_p9, %p790_p8 }
  0x4f   :  { %p793_p11 = pnand %p792_p10, %p786_p7 }
  0x51   :  { %796 = shalt.err (!%p793_p11)
}
  0x52   :  { %79 = dma.hbm_to_vmem [thread:$0]  %s972_s7, 4096, %s74_s28, [#allocation9], %s807_s0, %s807_s0, %s808_s23  }
  0x53   :  { %797 = dma.done.wait [#allocation4], 128  }
  0x54   :  { %798 = vsyncadd [#allocation4], 4294967168 }
  0x55   :  { %799 = dma.done.wait [#allocation6], 384  }
  0x56   :  { %800 = vsyncadd [#allocation6], 4294966912 }
  0x57   :  { %801 = dma.done.wait [#allocation9], 4224  }
  0x58   :  { %802 = vsyncadd [#allocation9], 4294963072  ;;  %v810_v0 = vmov 0   ;;  %v108_v1 = vld [vmem:[%s969_s4] sm:$0x77]  ;;  %vm118_vm0 = vcmask 1042432   ;;  %v288_v54 = vlaneseq }
  0x59   :  { %157 = vmatprep.mubr.bf16.mxu0 %v810_v0  ;;  %v106_v2 = vld [vmem:[#allocation5] sm:$0xff]  ;;  %v581_v3 = vcombine.high %v108_v1, %v108_v1  ;;  %v580_v4 = vcombine.low %v108_v1, %v108_v1  ;;  %v634_v5 = vld [vmem:[#allocation7 + $0x4] ss:$8 sps:$4 sm:$0x3f]   ;;  %vm178_vm1 = vcmask 1045504   ;;  %vm114_vm2 = vcmask 48128  }
  0x5a   :  { %v636_v6 = vld [vmem:[#allocation7] ss:$8 sps:$4 sm:$0x3f]   ;;  %v228_v7 = vld [vmem:[#allocation8] sm:$0x77]  ;;  %v107_v9 = vpack.c.bf16 %v106_v2, %v106_v2  ;;  %vm174_vm3 = vcmask 97280  }
  0x5b   :  { %582 = vmatprep.subr.msk.bf16.mxu0 %vm118_vm0, %v581_v3  ;;  %v120_v8 = vsel %vm118_vm0, %v580_v4, 0  ;;  %v639_v10 = vld [vmem:[#allocation10 + $0x4] ss:$8 sps:$4 sm:$0xff]   ;;  %v641_v11 = vld [vmem:[#allocation10] ss:$8 sps:$4 sm:$0xff]   ;;  %v180_v12 = vsel %vm178_vm1, %v636_v6, 0  ;;  %v589_v13 = vcombine.high %v228_v7, %v228_v7  ;;  %v588_v18 = vcombine.low %v228_v7, %v228_v7 }
  0x5c   :  { %126 = vmatpush1.bf16.msra.mxu0 %v120_v8  ;;  %508 = vmatprep.subr.bf16.mxu1 %v639_v10  ;;  %v642_v14 = vld [vmem:[#allocation10 + $0x14] ss:$8 sps:$4 sm:$0xff]   ;;  %v644_v15 = vld [vmem:[#allocation10 + $0x10] ss:$8 sps:$4 sm:$0xff]   ;;  %v645_v16 = vld [vmem:[#allocation10 + $0x24] ss:$8 sps:$4 sm:$0xff]  }
  0x5d   :  { %586 = vmatprep.subr.msk.bf16.mxu0 %vm178_vm1, %v634_v5  ;;  %509 = vmatpush1.bf16.msra.mxu1 %v641_v11  ;;  %v102_v17 = vld [vmem:[#allocation3] sm:$0xff]  ;;  %v647_v19 = vld [vmem:[#allocation10 + $0x20] ss:$8 sps:$4 sm:$0xff]   ;;  %v238_v22 = vsel %vm118_vm0, %v588_v18, 0  ;;  %v651_v25 = vld [vmem:[#allocation10 + $0x44] ss:$8 sps:$4 sm:$0xff]  }
  0x5e   :  { %510 = vmatprep.subr.bf16.mxu1 %v642_v14  ;;  %v103_v20 = vpack.c.bf16 %v102_v17, %v102_v17  ;;  %v648_v21 = vld [vmem:[#allocation10 + $0x34] ss:$8 sps:$4 sm:$0xff]   ;;  %v650_v24 = vld [vmem:[#allocation10 + $0x30] ss:$8 sps:$4 sm:$0xff]   ;;  %v653_v26 = vld [vmem:[#allocation10 + $0x40] ss:$8 sps:$4 sm:$0xff]  }
  0x5f   :  { %583 = vmatmul.mubr.msk.bf16.vlgmr.msra.gmra.mrb[0].mxu0 %vm114_vm2, %v107_v9  ;;  %v226_v23 = vld [vmem:[%s967_s2] sm:$0xff]  ;;  %v657_v30 = vld [vmem:[#allocation10 + $0x64] ss:$8 sps:$4 sm:$0xff]   ;;  %v659_v31 = vld [vmem:[#allocation10 + $0x60] ss:$8 sps:$4 sm:$0xff]   ;;  %v289_v55 = vshrl.u32 %v288_v54, 7 }
  0x60   :  { %186 = vmatpush1.bf16.msra.mxu0 %v180_v12  ;;  %217 = vmatprep.mubr.bf16.mxu0 %v810_v0  ;;  %v654_v27 = vld [vmem:[#allocation10 + $0x54] ss:$8 sps:$4 sm:$0xff]   ;;  %v227_v28 = vpack.c.bf16 %v226_v23, %v226_v23  ;;  %v656_v29 = vld [vmem:[#allocation10 + $0x50] ss:$8 sps:$4 sm:$0xff]   ;;  %v663_v34 = vld [vmem:[#allocation10 + $0x84] ss:$8 sps:$4 sm:$0xff]  }
  0x61   :  { %590 = vmatprep.subr.msk.bf16.mxu0 %vm118_vm0, %v589_v13  ;;  %511 = vmatpush1.bf16.msra.mxu1 %v644_v15  ;;  %v660_v32 = vld [vmem:[#allocation10 + $0x74] ss:$8 sps:$4 sm:$0xff]   ;;  %v662_v33 = vld [vmem:[#allocation10 + $0x70] ss:$8 sps:$4 sm:$0xff]   ;;  %v665_v35 = vld [vmem:[#allocation10 + $0x80] ss:$8 sps:$4 sm:$0xff]  }
  0x62   :  { %512 = vmatprep.subr.bf16.mxu1 %v645_v16  ;;  %v666_v36 = vld [vmem:[#allocation10 + $0x94] ss:$8 sps:$4 sm:$0xff]   ;;  %v668_v37 = vld [vmem:[#allocation10 + $0x90] ss:$8 sps:$4 sm:$0xff]   ;;  %v669_v38 = vld [vmem:[#allocation10 + $0xa4] ss:$8 sps:$4 sm:$0xff]  }
  0x63   :  { %v671_v39 = vld [vmem:[#allocation10 + $0xa0] ss:$8 sps:$4 sm:$0xff]   ;;  %v672_v40 = vld [vmem:[#allocation10 + $0xb4] ss:$8 sps:$4 sm:$0xff]   ;;  %v674_v41 = vld [vmem:[#allocation10 + $0xb0] ss:$8 sps:$4 sm:$0xff]  }
  0x64   :  { %v675_v42 = vld [vmem:[#allocation10 + $0xc4] ss:$8 sps:$4 sm:$0xff]   ;;  %v677_v43 = vld [vmem:[#allocation10 + $0xc0] ss:$8 sps:$4 sm:$0xff]   ;;  %v678_v44 = vld [vmem:[#allocation10 + $0xd4] ss:$8 sps:$4 sm:$0xff]  }
  0x65   :  { %513 = vmatpush1.bf16.msra.mxu1 %v647_v19  ;;  %v680_v45 = vld [vmem:[#allocation10 + $0xd0] ss:$8 sps:$4 sm:$0xff]   ;;  %v681_v46 = vld [vmem:[#allocation10 + $0xe4] ss:$8 sps:$4 sm:$0xff]   ;;  %v683_v47 = vld [vmem:[#allocation10 + $0xe0] ss:$8 sps:$4 sm:$0xff]  }
  0x66   :  { %514 = vmatprep.subr.bf16.mxu1 %v648_v21  ;;  %v684_v48 = vld [vmem:[#allocation10 + $0xf4] ss:$8 sps:$4 sm:$0xff]   ;;  %v686_v49 = vld [vmem:[#allocation10 + $0xf0] ss:$8 sps:$4 sm:$0xff]   ;;  %v290_v62 = vsub.s32 0, %v289_v55  ;;  %vm571_vm4 = vcmask 7168  }
  0x67   :  { %587 = vmatmul.mubr.msk.bf16.vlgmr.msra.gmra.mrb[4].mxu0 %vm174_vm3, %v103_v20  ;;  %v286_v63 = vld [vmem:[%s971_s6] sm:$0x3] }
  0x68   :  { %244 = vmatpush1.bf16.msra.mxu0 %v238_v22  ;;  %275 = vmatprep.mubr.bf16.mxu0 %v810_v0  ;;  %v294_v0 = vsub.s32 1, %v289_v55  ;;  %v291_v1 = vrot.slane %v286_v63, %v290_v62  ;;  %v336_v15 = vld [vmem:[%s973_s8] sm:$0x3] }
  0x69   :  { %515 = vmatpush1.bf16.msra.mxu1 %v650_v24  ;;  %v341_v16 = vrot.slane %v336_v15, %v290_v62  ;;  %v551_v18 = vld [vmem:[%s974_s9] sm:$0x3] }
  0x6a   :  { %516 = vmatprep.subr.bf16.mxu1 %v651_v25  ;;  %v295_v3 = vrot.slane %v286_v63, %v294_v0  ;;  %v345_v17 = vrot.slane %v336_v15, %v294_v0  ;;  %v556_v22 = vrot.slane %v551_v18, %v290_v62  ;;  %v560_v25 = vrot.slane %v551_v18, %v294_v0 }
  0x6d   :  { %517 = vmatpush1.bf16.msra.mxu1 %v653_v26 }
  0x6e   :  { %518 = vmatprep.subr.bf16.mxu1 %v654_v27 }
  0x6f   :  { %591 = vmatmul.mubr.msk.bf16.vlgmr.msra.gmra.mrb[8].mxu0 %vm114_vm2, %v227_v28 }
  0x71   :  { %519 = vmatpush1.bf16.msra.mxu1 %v656_v29 }
  0x72   :  { %520 = vmatprep.subr.bf16.mxu1 %v657_v30 }
  0x75   :  { %521 = vmatpush1.bf16.msra.mxu1 %v659_v31 }
  0x76   :  { %522 = vmatprep.subr.bf16.mxu1 %v660_v32  ;;  %v569_v32 = vstv %s975_s10 }
  0x79   :  { %523 = vmatpush1.bf16.msra.mxu1 %v662_v33 }
  0x7a   :  { %524 = vmatprep.subr.bf16.mxu1 %v663_v34 }
  0x7d   :  { %525 = vmatpush1.bf16.msra.mxu1 %v665_v35 }
  0x7e   :  { %526 = vmatprep.subr.bf16.mxu1 %v666_v36 }
  0x81   :  { %527 = vmatpush1.bf16.msra.mxu1 %v668_v37 }
  0x82   :  { %528 = vmatprep.subr.bf16.mxu1 %v669_v38 }
  0x85   :  { %529 = vmatpush1.bf16.msra.mxu1 %v671_v39 }
  0x86   :  { %530 = vmatprep.subr.bf16.mxu1 %v672_v40 }
  0x89   :  { %531 = vmatpush1.bf16.msra.mxu1 %v674_v41 }
  0x8a   :  { %532 = vmatprep.subr.bf16.mxu1 %v675_v42 }
  0x8d   :  { %533 = vmatpush1.bf16.msra.mxu1 %v677_v43 }
  0x8e   :  { %534 = vmatprep.subr.bf16.mxu1 %v678_v44 }
  0x91   :  { %535 = vmatpush1.bf16.msra.mxu1 %v680_v45 }
  0x92   :  { %536 = vmatprep.subr.bf16.mxu1 %v681_v46 }
  0x95   :  { %537 = vmatpush1.bf16.msra.mxu1 %v683_v47 }
  0x96   :  { %538 = vmatprep.subr.bf16.mxu1 %v684_v48 }
  0x99   :  { %539 = vmatpush1.bf16.msra.mxu1 %v686_v49 }
 0x132   :  { %v159_v50 = vpop.f32.mrb[0].mxu0 }
 0x133   :  { %v161_v51 = vpop.f32.mrb[1].mxu0 }
 0x134   :  { %v163_v52 = vpop.f32.mrb[2].mxu0 }
 0x135   :  { %v164_v53 = vpop.f32.mrb[3].mxu0 }
 0x13a   :  { %v219_v56 = vpop.f32.mrb[4].mxu0 }
 0x13b   :  { %v220_v57 = vadd.f32 %v219_v56, %v159_v50  ;;  %v221_v58 = vpop.f32.mrb[5].mxu0 }
 0x13c   :  { %v222_v59 = vadd.f32 %v221_v58, %v161_v51  ;;  %v223_v60 = vpop.f32.mrb[6].mxu0 }
 0x13d   :  { %v224_v61 = vpop.f32.mrb[7].mxu0 }
 0x142   :  { %v277_v2 = vpop.f32.mrb[8].mxu0 }
 0x143   :  { %v284_v4 = vadd.f32 %v277_v2, %v220_v57  ;;  %v279_v5 = vpop.f32.mrb[9].mxu0 }
 0x144   :  { %v285_v6 = vadd.f32 %v279_v5, %v222_v59  ;;  %v281_v7 = vpop.f32.mrb[10].mxu0 }
 0x145   :  { %v298_v8 = vadd.f32 %v291_v1, %v284_v4  ;;  %v282_v9 = vpop.f32.mrb[11].mxu0 }
 0x146   :  { %v299_v10 = vadd.f32 %v295_v3, %v285_v6 }
 0x147   :  { %v300_v11 = vmax.f32 %v298_v8, 0.0 }
 0x148   :  { %v301_v12 = vmax.f32 %v299_v10, 0.0 }
 0x149   :  { %v302_v14 = vpack.c.bf16 %v300_v11, %v300_v11 }
 0x14a   :  { %v303_v13 = vpack.c.bf16 %v301_v12, %v301_v12 }
 0x14c   :  { %540 = vmatprep.mubr.bf16.mxu1 %v303_v13 }
 0x14d   :  { %541 = vmatmul.mubr.bf16.vlgmr.msra.gmra.mrb[0].mxu1 %v302_v14 }
 0x220   :  { %v542_v19 = vpop.f32.mrb[0].mxu1 }
 0x221   :  { %v543_v20 = vadd.f32 %v542_v19, %v341_v16  ;;  %v544_v21 = vpop.f32.mrb[1].mxu1 }
 0x222   :  { %v545_v23 = vadd.f32 %v544_v21, %v345_v17  ;;  %v546_v24 = vpop.f32.mrb[2].mxu1 }
 0x223   :  { %v549_v26 = vmax.f32 %v543_v20, 0.0  ;;  %v547_v27 = vpop.f32.mrb[3].mxu1 }
 0x224   :  { %v550_v28 = vmax.f32 %v545_v23, 0.0 }
 0x225   :  { %v563_v29 = vmul.f32 %v556_v22, %v549_v26 }
 0x226   :  { %v564_v30 = vmul.f32 %v560_v25, %v550_v28 }
 0x228   :  { %v565_v31 = vadd.f32 %v564_v30, %v563_v29 }
 0x22a   :  { %566 = vadd.xlane.f32.xlu0 %v565_v31 }
 0x2b7   :  { %v567_v33 = vpop.xlane.xlu0 %566 }
 0x2b8   :  { %v570_v34 = vadd.f32 %v569_v32, %v567_v33 }
 0x2ba   :  { %572 = vst.msk [vmem:[%s976_s11] sm:$0xff] %vm571_vm4, %v570_v34 }
 0x2bb   :  { %577 = vsyncpa [#allocation4], 1 }
 0x2bc   :  { %578 = vsyncpa [#allocation6], 1 }
 0x2bd   :  { %579 = vsyncpa [#allocation9], 1 }

</bundles_post_ra>
